<compile_context>
chip_gen: v5e
topology: v5e:2x2
jax: 0.10.0
libtpu: 0.0.40
codegen_flags: <defaults>
</compile_context>

<pallas_src>
import jax
import jax.numpy as jnp
from jax.experimental import pallas as pl
from jax.experimental.pallas import tpu as pltpu

LATENT_DIM = 3
NUM_CLASSES = 10
EMB_DIM = 16
HIDDEN_DIM = 128
OUT_DIM = 28 * 28
PACKED_IN = 16            # [latent(3) | one_hot(10) | bias-1(1) | zero pad(2)]
BIAS_COL = LATENT_DIM + NUM_CLASSES        # column 13 carries a constant 1.0
MAX_TILE_B = 2048         # batch tile; ~20 MB VMEM at f32, safe on v7x's 64 MiB


def _round_up(x, m):
    return ((x + m - 1) // m) * m


def _decoder_kernel(
    x_ref,         # (TB, PACKED_IN)       f32  packed [latent | one_hot | 1 | 0]
    w_h_ref,       # (PACKED_IN, HIDDEN)   f32  stacked hidden weight (+ b_h row)
    w_out_ref,     # (HIDDEN, OUT_DIM)     f32
    b_out_ref,     # (1, OUT_DIM)          f32
    out_ref,       # (TB, OUT_DIM)         f32
):
    # Single K=16 MXU matmul covers: embedding Linear+ReLU (precomputed table
    # rows), both halves of the concat-Linear, and the hidden bias (ones col).
    hidden = jnp.dot(x_ref[...], w_h_ref[...],
                     preferred_element_type=jnp.float32)
    hidden = jnp.maximum(hidden, 0.0)                  # (TB, 128)

    logits = jnp.dot(hidden, w_out_ref[...],
                     preferred_element_type=jnp.float32) + b_out_ref[...]

    # sigmoid(z) == 0.5 * (tanh(0.5 z) + 1): one EUP op over the big tile.
    out_ref[...] = 0.5 * (jnp.tanh(0.5 * logits) + 1.0)


def prepare_decoder_params(params):
    """One-time preprocessing of PyTorch-layout params (hoisted off hot path)."""
    w_emb_t = params["w_emb"].T                                  # (10, 16)
    emb_rows = jax.nn.relu(w_emb_t + params["b_emb"][None, :])   # (10, 16)

    w_h_t = params["w_h"].T                                      # (19, 128)
    w_h_lat = w_h_t[:LATENT_DIM, :]                              # (3, 128)
    w_h_emb = w_h_t[LATENT_DIM:, :]                              # (16, 128)
    emb_table = emb_rows @ w_h_emb                               # (10, 128)

    b_h_row = params["b_h"].reshape(1, HIDDEN_DIM)               # (1, 128)
    pad_rows = PACKED_IN - LATENT_DIM - NUM_CLASSES - 1          # 2
    w_stacked = jnp.concatenate(
        [w_h_lat, emb_table, b_h_row,
         jnp.zeros((pad_rows, HIDDEN_DIM), jnp.float32)], axis=0)  # (16, 128)

    return {
        "w_h": w_stacked.astype(jnp.float32),
        "w_out": params["w_out"].T.astype(jnp.float32),          # (128, 784)
        "b_out": params["b_out"].reshape(1, OUT_DIM).astype(jnp.float32),
    }


@jax.jit
def decoder_forward(latent_vector, label, prepared):
    """latent_vector: (B, 3) f32, label: (B,) int -> (B, 1, 28, 28) f32."""
    B = latent_vector.shape[0]

    # Tiling: >=2 evenly sized grid steps (v7x megacore), tile multiple of 8,
    # batch padded to num_tiles * tile_b so no masked partial block exists.
    num_tiles = max(2, pl.cdiv(B, MAX_TILE_B))
    tile_b = max(8, _round_up(pl.cdiv(B, num_tiles), 8))
    b_pad = num_tiles * tile_b

    # Packed input: [latent(3) | one_hot(10) | 1.0 | 0 | 0].  Padded rows are
    # all-zero and their outputs are discarded by the final slice.
    one_hot = jax.nn.one_hot(label.astype(jnp.int32), NUM_CLASSES,
                             dtype=jnp.float32)                    # (B, 10)
    packed = jnp.concatenate(
        [latent_vector.astype(jnp.float32),
         one_hot,
         jnp.ones((B, 1), jnp.float32),
         jnp.zeros((B, PACKED_IN - BIAS_COL - 1), jnp.float32)],
        axis=1)                                                    # (B, 16)
    packed = jnp.pad(packed, ((0, b_pad - B), (0, 0)))             # (b_pad, 16)

    row_spec = lambda shape: pl.BlockSpec(shape, lambda i: (i, 0))
    const_spec = lambda shape: pl.BlockSpec(shape, lambda i: (0, 0))

    out_flat = pl.pallas_call(
        _decoder_kernel,
        out_shape=jax.ShapeDtypeStruct((b_pad, OUT_DIM), jnp.float32),
        grid=(num_tiles,),
        in_specs=[
            row_spec((tile_b, PACKED_IN)),            # packed input, tiled
            const_spec((PACKED_IN, HIDDEN_DIM)),      # stacked hidden weight
            const_spec((HIDDEN_DIM, OUT_DIM)),        # output weight
            const_spec((1, OUT_DIM)),                 # output bias
        ],
        out_specs=row_spec((tile_b, OUT_DIM)),
        compiler_params=pltpu.CompilerParams(
            dimension_semantics=("parallel",),
            vmem_limit_bytes=32 << 20,
        ),
    )(packed, prepared["w_h"], prepared["w_out"], prepared["b_out"])

    # Drop padded rows; .view(-1, 1, 28, 28) equivalent (NCHW).
    return out_flat[:B].reshape(B, 1, 28, 28)


def init_params(key):
    """Deterministic synthetic parameters with PyTorch-Linear shapes."""
    k1, k2, k3, k4, k5, k6 = jax.random.split(key, 6)
    scale = 0.1
    return {
        "w_emb": scale * jax.random.normal(k1, (EMB_DIM, NUM_CLASSES), jnp.float32),
        "b_emb": scale * jax.random.normal(k2, (EMB_DIM,), jnp.float32),
        "w_h": scale * jax.random.normal(k3, (HIDDEN_DIM, LATENT_DIM + EMB_DIM), jnp.float32),
        "b_h": scale * jax.random.normal(k4, (HIDDEN_DIM,), jnp.float32),
        "w_out": scale * jax.random.normal(k5, (OUT_DIM, HIDDEN_DIM), jnp.float32),
        "b_out": scale * jax.random.normal(k6, (OUT_DIM,), jnp.float32),
    }


def _reference_forward(latent_vector, label, params):
    """Plain-JAX reference mirroring the PyTorch forward."""
    one_hot = jax.nn.one_hot(label, NUM_CLASSES, dtype=jnp.float32)
    emb = jax.nn.relu(one_hot @ params["w_emb"].T + params["b_emb"])
    concat = jnp.concatenate([latent_vector, emb], axis=1)
    hidden = jax.nn.relu(concat @ params["w_h"].T + params["b_h"])
    out = jax.nn.sigmoid(hidden @ params["w_out"].T + params["b_out"])
    return out.reshape(-1, 1, 28, 28)


if __name__ == "__main__":
    key = jax.random.PRNGKey(0)
    kp, kl, kc = jax.random.split(key, 3)

    B = 2
    params = init_params(kp)
    prepared = prepare_decoder_params(params)   # one-time weight prep
    latent = jax.random.normal(kl, (B, LATENT_DIM), jnp.float32)
    label = jax.random.randint(kc, (B,), 0, NUM_CLASSES, jnp.int32)

    out = decoder_forward(latent, label, prepared)
    out = jax.block_until_ready(out)

    ref = _reference_forward(latent, label, params)
    assert out.shape == (B, 1, 28, 28), out.shape
    assert jnp.allclose(out, ref, atol=1e-5, rtol=1e-5), "mismatch vs reference"

    print("KERNEL_OK")
</pallas_src>

<mosaic_0001>
module attributes {stable_mosaic.version = 11 : i64} {
  func.func @_decoder_kernel(%arg0: i32, %arg1: memref<8x16xf32, #tpu.memory_space<vmem>>, %arg2: memref<16x128xf32, #tpu.memory_space<vmem>>, %arg3: memref<128x784xf32, #tpu.memory_space<vmem>>, %arg4: memref<1x784xf32, #tpu.memory_space<vmem>>, %arg5: memref<8x784xf32, #tpu.memory_space<vmem>>) attributes {dimension_semantics = [#tpu.dimension_semantics<parallel>], iteration_bounds = array<i64: 2>, scalar_prefetch = 0 : i64, scratch_operands = 0 : i64, tpu.core_type = #tpu.core_type<tc>, window_params = [{transform_indices = @transform_0, window_bounds = array<i64: 8, 16>}, {pipeline_mode = #tpu.pipeline_mode<synchronous>, transform_indices = @transform_1, window_bounds = array<i64: 16, 128>}, {pipeline_mode = #tpu.pipeline_mode<synchronous>, transform_indices = @transform_2, window_bounds = array<i64: 128, 784>}, {pipeline_mode = #tpu.pipeline_mode<synchronous>, transform_indices = @transform_3, window_bounds = array<i64: 1, 784>}, {transform_indices = @transform_4, window_bounds = array<i64: 8, 784>}]} {
    %c0 = arith.constant 0 : index
    %c0_0 = arith.constant 0 : index
    %0 = vector.load %arg1[%c0, %c0_0] : memref<8x16xf32, #tpu.memory_space<vmem>>, vector<8x16xf32>
    %c0_1 = arith.constant 0 : index
    %c0_2 = arith.constant 0 : index
    %1 = vector.load %arg2[%c0_1, %c0_2] : memref<16x128xf32, #tpu.memory_space<vmem>>, vector<16x128xf32>
    %cst = arith.constant dense<0.000000e+00> : vector<8x128xf32>
    %2 = tpu.matmul %0, %1, %cst {dimension_numbers = #tpu.dot_dimension_numbers<[1], [0], [0], [1], [0, 0, 1, 1], [], []>} : vector<8x16xf32>, vector<16x128xf32>, vector<8x128xf32> -> vector<8x128xf32>
    %cst_3 = arith.constant 0.000000e+00 : f32
    %3 = vector.broadcast %cst_3 : f32 to vector<8x128xf32>
    %4 = arith.maximumf %2, %3 : vector<8x128xf32>
    %c0_4 = arith.constant 0 : index
    %c0_5 = arith.constant 0 : index
    %5 = vector.load %arg3[%c0_4, %c0_5] : memref<128x784xf32, #tpu.memory_space<vmem>>, vector<128x784xf32>
    %cst_6 = arith.constant dense<0.000000e+00> : vector<8x784xf32>
    %6 = tpu.matmul %4, %5, %cst_6 {dimension_numbers = #tpu.dot_dimension_numbers<[1], [0], [0], [1], [0, 0, 1, 1], [], []>} : vector<8x128xf32>, vector<128x784xf32>, vector<8x784xf32> -> vector<8x784xf32>
    %c0_7 = arith.constant 0 : index
    %c0_8 = arith.constant 0 : index
    %7 = vector.load %arg4[%c0_7, %c0_8] : memref<1x784xf32, #tpu.memory_space<vmem>>, vector<1x784xf32>
    %8 = vector.broadcast %7 : vector<1x784xf32> to vector<8x784xf32>
    %9 = arith.addf %6, %8 : vector<8x784xf32>
    %cst_9 = arith.constant 5.000000e-01 : f32
    %10 = vector.broadcast %cst_9 : f32 to vector<8x784xf32>
    %11 = arith.mulf %10, %9 : vector<8x784xf32>
    %12 = math.tanh %11 : vector<8x784xf32>
    %cst_10 = arith.constant 1.000000e+00 : f32
    %13 = vector.broadcast %cst_10 : f32 to vector<8x784xf32>
    %14 = arith.addf %12, %13 : vector<8x784xf32>
    %cst_11 = arith.constant 5.000000e-01 : f32
    %15 = vector.broadcast %cst_11 : f32 to vector<8x784xf32>
    %16 = arith.mulf %15, %14 : vector<8x784xf32>
    %c0_12 = arith.constant 0 : index
    %c0_13 = arith.constant 0 : index
    %17 = vector.load %arg5[%c0_12, %c0_13] : memref<8x784xf32, #tpu.memory_space<vmem>>, vector<8x784xf32>
    tpu.vector_store %arg5[%c0_12, %c0_13], %16 {strides = array<i32>} : memref<8x784xf32, #tpu.memory_space<vmem>>, vector<8x784xf32>,
    return
  }
  func.func @transform_0(%arg0: i32) -> (i32, i32) {
    %c0_i32 = arith.constant 0 : i32
    %c0_i32_0 = arith.constant 0 : i32
    return %arg0, %c0_i32 : i32, i32
  }
  func.func @transform_1(%arg0: i32) -> (i32, i32) {
    %c0_i32 = arith.constant 0 : i32
    %c0_i32_0 = arith.constant 0 : i32
    %c0_i32_1 = arith.constant 0 : i32
    return %c0_i32, %c0_i32_0 : i32, i32
  }
  func.func @transform_2(%arg0: i32) -> (i32, i32) {
    %c0_i32 = arith.constant 0 : i32
    %c0_i32_0 = arith.constant 0 : i32
    %c0_i32_1 = arith.constant 0 : i32
    return %c0_i32, %c0_i32_0 : i32, i32
  }
  func.func @transform_3(%arg0: i32) -> (i32, i32) {
    %c0_i32 = arith.constant 0 : i32
    %c0_i32_0 = arith.constant 0 : i32
    %c0_i32_1 = arith.constant 0 : i32
    return %c0_i32, %c0_i32_0 : i32, i32
  }
  func.func @transform_4(%arg0: i32) -> (i32, i32) {
    %c0_i32 = arith.constant 0 : i32
    %c0_i32_0 = arith.constant 0 : i32
    return %arg0, %c0_i32 : i32, i32
  }
}

</mosaic_0001>

<bundles_post_ra>
// kernel: decoder_forward.1
= control target key start
LH: loop header
LB: loop body
LE: loop exit
PB: predicated region body
PF: predicated region fallthrough
CT: control target
= control target key end

     0   :  { %s647_s15 = smov 0   ;;  %s1024_s0 = inlined_call_operand.vmem [shape: f32[16,16], index: 0, kind: input, shape index: {}]   ;;  %s1025_s1 = inlined_call_operand.vmem [shape: f32[16,128], index: 1, kind: input, shape index: {}]   ;;  %s1026_s2 = inlined_call_operand.vmem [shape: f32[128,784], index: 2, kind: input, shape index: {}]   ;;  %s1027_s3 = inlined_call_operand.vmem [shape: f32[1,784], index: 3, kind: input, shape index: {}]   ;;  %s1028_s4 = inlined_call_operand.vmem [shape: f32[16,784], index: 4, kind: output, shape index: {}]  }
   0x1 LB: > { %s581_s16 = sadd.s32 4294967295, %s620_s15   ;;  %p585_p0 = scmp.ge.s32.totalorder %s620_s15, 1  ;;  %s620_s15 = sphi %s647_s15, %s14_s15  }
   0x2   : > { %p161_p1 = scmp.lt.s32.totalorder %s620_s15, 3 }
   0x4   : > { %p162_p2 = pnand %p585_p0, %p161_p1 }
   0x5   : > { %p186_p3 = scmp.lt.s32.totalorder (!%p162_p2), %s581_s16, 1 }
   0x6   : > { %165 = sbr.rel (%p162_p2) target bundleno = 303 (0x12f), region = 36 }
   0xb   : > { %v197_v0 = vld [vmem:[%s1025_s1 + $0x8] sm:$0xff]  ;;  %v196_v1 = vld [vmem:[%s1025_s1] sm:$0xff]  ;;  %v329_v3 = vld [vmem:[%s1026_s2 + $0x350] sm:$0xff]  ;;  %s1030_s16 = smov (!%p186_p3, %s581_s16), 1  ;;  %vm198_vm0 = vcmask 130048  }
   0xc   : > { %v328_v2 = vld [vmem:[%s1026_s2 + $0x348] sm:$0xff]  ;;  %216 = vmatpush.msra.mxu0 %v197_v0  ;;  %v330_v4 = vld [vmem:[%s1026_s2 + $0x358] sm:$0xff]  ;;  %v321_v5 = vld [vmem:[%s1026_s2 + $0x310] sm:$0xff]  ;;  %371 = vmatpush.msra.mxu2 %v329_v3  ;;  %s586_s13 = sshll.u32 %s1030_s16, 3  ;;  %s591_s9 = smul.u32 56, %s1030_s16 }
   0xd   : > { %351 = vmatpush.msra.mxu1 %v328_v2  ;;  %391 = vmatpush.msra.mxu3 %v330_v4  ;;  %v322_v6 = vld [vmem:[%s1026_s2 + $0x318] sm:$0xff]  ;;  %v323_v7 = vld [vmem:[%s1026_s2 + $0x320] sm:$0xff]  ;;  %v316_v10 = vld [vmem:[%s1026_s2 + $0x2e8] sm:$0xff]  ;;  %s189_s20 = scalar_lea.vmem %s1024_s0, %s586_s13 }
   0xe   : > { %v314_v8 = vld [vmem:[%s1026_s2 + $0x2d8] sm:$0xff]  ;;  %217 = vmatpush.msra.mxu0 %v196_v1  ;;  %v315_v9 = vld [vmem:[%s1026_s2 + $0x2e0] sm:$0xff]  ;;  %372 = vmatpush.msra.mxu2 %v322_v6  ;;  %v308_v12 = vld [vmem:[%s1026_s2 + $0x2a8] sm:$0xff]  ;;  %s1011_s12 = scalar_lea.vmem %s1028_s4, %s591_s9 }
   0xf   : > { %352 = vmatpush.msra.mxu1 %v321_v5  ;;  %392 = vmatpush.msra.mxu3 %v323_v7  ;;  %v307_v11 = vld [vmem:[%s1026_s2 + $0x2a0] sm:$0xff]  ;;  %v309_v13 = vld [vmem:[%s1026_s2 + $0x2b0] sm:$0xff]  ;;  %v300_v15 = vld [vmem:[%s1026_s2 + $0x268] sm:$0xff] }
  0x10   : > { %v195_v14 = vld [vmem:[%s189_s20] sm:$0xff]  ;;  %373 = vmatpush.msra.mxu2 %v315_v9  ;;  %v301_v16 = vld [vmem:[%s1026_s2 + $0x270] sm:$0xff]  ;;  %v302_v17 = vld [vmem:[%s1026_s2 + $0x278] sm:$0xff] }
  0x11   : > { %353 = vmatpush.msra.mxu1 %v314_v8  ;;  %393 = vmatpush.msra.mxu3 %v316_v10  ;;  %v293_v18 = vld [vmem:[%s1026_s2 + $0x230] sm:$0xff]  ;;  %v294_v19 = vld [vmem:[%s1026_s2 + $0x238] sm:$0xff]  ;;  %v295_v20 = vld [vmem:[%s1026_s2 + $0x240] sm:$0xff] }
  0x12   : > { %588 = vmatmul.msk.f32.vlgmr.msra.gmra.mxu0 %vm198_vm0, %v195_v14  ;;  %374 = vmatpush.msra.mxu2 %v308_v12  ;;  %v286_v21 = vld [vmem:[%s1026_s2 + $0x1f8] sm:$0xff]  ;;  %v287_v22 = vld [vmem:[%s1026_s2 + $0x200] sm:$0xff]  ;;  %v288_v23 = vld [vmem:[%s1026_s2 + $0x208] sm:$0xff] }
  0x13   : > { %354 = vmatpush.msra.mxu1 %v307_v11  ;;  %394 = vmatpush.msra.mxu3 %v309_v13  ;;  %v279_v24 = vld [vmem:[%s1026_s2 + $0x1c0] sm:$0xff]  ;;  %v280_v25 = vld [vmem:[%s1026_s2 + $0x1c8] sm:$0xff]  ;;  %v281_v26 = vld [vmem:[%s1026_s2 + $0x1d0] sm:$0xff] }
  0x14   : > { %375 = vmatpush.msra.mxu2 %v301_v16  ;;  %v331_v27 = vld [vmem:[%s1026_s2 + $0x360] sm:$0xff]  ;;  %v272_v28 = vld [vmem:[%s1026_s2 + $0x188] sm:$0xff]  ;;  %v273_v30 = vld [vmem:[%s1026_s2 + $0x190] sm:$0xff] }
  0x15   : > { %355 = vmatpush.msra.mxu1 %v300_v15  ;;  %395 = vmatpush.msra.mxu3 %v302_v17  ;;  %v324_v29 = vld [vmem:[%s1026_s2 + $0x328] sm:$0xff]  ;;  %v274_v31 = vld [vmem:[%s1026_s2 + $0x198] sm:$0xff]  ;;  %v265_v32 = vld [vmem:[%s1026_s2 + $0x150] sm:$0xff] }
  0x16   : > { %376 = vmatpush.msra.mxu2 %v294_v19  ;;  %411 = vmatpush.msrb.mxu0 %v331_v27  ;;  %v317_v33 = vld [vmem:[%s1026_s2 + $0x2f0] sm:$0xff]  ;;  %v266_v34 = vld [vmem:[%s1026_s2 + $0x158] sm:$0xff]  ;;  %v267_v35 = vld [vmem:[%s1026_s2 + $0x160] sm:$0xff] }
  0x17   : > { %356 = vmatpush.msra.mxu1 %v293_v18  ;;  %396 = vmatpush.msra.mxu3 %v295_v20  ;;  %v258_v36 = vld [vmem:[%s1026_s2 + $0x118] sm:$0xff]  ;;  %v259_v38 = vld [vmem:[%s1026_s2 + $0x120] sm:$0xff]  ;;  %v260_v39 = vld [vmem:[%s1026_s2 + $0x128] sm:$0xff] }
  0x18   : > { %377 = vmatpush.msra.mxu2 %v287_v22  ;;  %412 = vmatpush.msrb.mxu0 %v324_v29  ;;  %v310_v37 = vld [vmem:[%s1026_s2 + $0x2b8] sm:$0xff]  ;;  %v251_v40 = vld [vmem:[%s1026_s2 + $0xe0] sm:$0xff]  ;;  %v252_v42 = vld [vmem:[%s1026_s2 + $0xe8] sm:$0xff] }
  0x19   : > { %357 = vmatpush.msra.mxu1 %v286_v21  ;;  %397 = vmatpush.msra.mxu3 %v288_v23  ;;  %v303_v41 = vld [vmem:[%s1026_s2 + $0x280] sm:$0xff]  ;;  %v253_v43 = vld [vmem:[%s1026_s2 + $0xf0] sm:$0xff]  ;;  %v244_v44 = vld [vmem:[%s1026_s2 + $0xa8] sm:$0xff] }
  0x1a   : > { %378 = vmatpush.msra.mxu2 %v280_v25  ;;  %413 = vmatpush.msrb.mxu0 %v317_v33  ;;  %v296_v45 = vld [vmem:[%s1026_s2 + $0x248] sm:$0xff]  ;;  %v245_v46 = vld [vmem:[%s1026_s2 + $0xb0] sm:$0xff]  ;;  %v246_v47 = vld [vmem:[%s1026_s2 + $0xb8] sm:$0xff] }
  0x1b   : > { %358 = vmatpush.msra.mxu1 %v279_v24  ;;  %398 = vmatpush.msra.mxu3 %v281_v26  ;;  %v237_v48 = vld [vmem:[%s1026_s2 + $0x70] sm:$0xff]  ;;  %v238_v50 = vld [vmem:[%s1026_s2 + $0x78] sm:$0xff]  ;;  %v239_v51 = vld [vmem:[%s1026_s2 + $0x80] sm:$0xff] }
  0x1c   : > { %379 = vmatpush.msra.mxu2 %v273_v30  ;;  %414 = vmatpush.msrb.mxu0 %v310_v37  ;;  %v289_v49 = vld [vmem:[%s1026_s2 + $0x210] sm:$0xff]  ;;  %v230_v52 = vld [vmem:[%s1026_s2 + $0x38] sm:$0xff]  ;;  %v231_v54 = vld [vmem:[%s1026_s2 + $0x40] sm:$0xff] }
  0x1d   : > { %359 = vmatpush.msra.mxu1 %v272_v28  ;;  %399 = vmatpush.msra.mxu3 %v274_v31  ;;  %v282_v53 = vld [vmem:[%s1026_s2 + $0x1d8] sm:$0xff]  ;;  %v232_v55 = vld [vmem:[%s1026_s2 + $0x48] sm:$0xff]  ;;  %v223_v56 = vld [vmem:[%s1026_s2] sm:$0xff] }
  0x1e   : > { %380 = vmatpush.msra.mxu2 %v266_v34  ;;  %415 = vmatpush.msrb.mxu0 %v303_v41  ;;  %v275_v57 = vld [vmem:[%s1026_s2 + $0x1a0] sm:$0xff]  ;;  %v224_v58 = vld [vmem:[%s1026_s2 + $0x8] sm:$0xff]  ;;  %v225_v59 = vld [vmem:[%s1026_s2 + $0x10] sm:$0xff] }
  0x1f   : > { %360 = vmatpush.msra.mxu1 %v265_v32  ;;  %400 = vmatpush.msra.mxu3 %v267_v35  ;;  %v332_v60 = vld [vmem:[%s1026_s2 + $0x368] sm:$0xff]  ;;  %v333_v61 = vld [vmem:[%s1026_s2 + $0x370] sm:$0xff]  ;;  %v334_v62 = vld [vmem:[%s1026_s2 + $0x378] sm:$0xff] }
  0x20   : > { %381 = vmatpush.msra.mxu2 %v259_v38  ;;  %416 = vmatpush.msrb.mxu0 %v296_v45  ;;  %v268_v63 = vld [vmem:[%s1026_s2 + $0x168] sm:$0xff]  ;;  %v325_v0 = vld [vmem:[%s1026_s2 + $0x330] sm:$0xff]  ;;  %v326_v1 = vld [vmem:[%s1026_s2 + $0x338] sm:$0xff] }
  0x21   : > { %361 = vmatpush.msra.mxu1 %v258_v36  ;;  %401 = vmatpush.msra.mxu3 %v260_v39  ;;  %v327_v2 = vld [vmem:[%s1026_s2 + $0x340] sm:$0xff]  ;;  %v261_v3 = vld [vmem:[%s1026_s2 + $0x130] sm:$0xff]  ;;  %v318_v4 = vld [vmem:[%s1026_s2 + $0x2f8] sm:$0xff] }
  0x22   : > { %382 = vmatpush.msra.mxu2 %v252_v42  ;;  %417 = vmatpush.msrb.mxu0 %v289_v49  ;;  %v319_v5 = vld [vmem:[%s1026_s2 + $0x300] sm:$0xff]  ;;  %v320_v6 = vld [vmem:[%s1026_s2 + $0x308] sm:$0xff]  ;;  %v254_v7 = vld [vmem:[%s1026_s2 + $0xf8] sm:$0xff] }
  0x23   : > { %362 = vmatpush.msra.mxu1 %v251_v40  ;;  %402 = vmatpush.msra.mxu3 %v253_v43  ;;  %v311_v8 = vld [vmem:[%s1026_s2 + $0x2c0] sm:$0xff]  ;;  %v312_v9 = vld [vmem:[%s1026_s2 + $0x2c8] sm:$0xff]  ;;  %v313_v10 = vld [vmem:[%s1026_s2 + $0x2d0] sm:$0xff] }
  0x24   : > { %383 = vmatpush.msra.mxu2 %v245_v46  ;;  %418 = vmatpush.msrb.mxu0 %v282_v53  ;;  %v247_v11 = vld [vmem:[%s1026_s2 + $0xc0] sm:$0xff]  ;;  %v304_v12 = vld [vmem:[%s1026_s2 + $0x288] sm:$0xff]  ;;  %v305_v13 = vld [vmem:[%s1026_s2 + $0x290] sm:$0xff] }
  0x25   : > { %363 = vmatpush.msra.mxu1 %v244_v44  ;;  %403 = vmatpush.msra.mxu3 %v246_v47  ;;  %v306_v14 = vld [vmem:[%s1026_s2 + $0x298] sm:$0xff]  ;;  %v240_v15 = vld [vmem:[%s1026_s2 + $0x88] sm:$0xff]  ;;  %v297_v16 = vld [vmem:[%s1026_s2 + $0x250] sm:$0xff] }
  0x26   : > { %384 = vmatpush.msra.mxu2 %v238_v50  ;;  %419 = vmatpush.msrb.mxu0 %v275_v57  ;;  %v298_v17 = vld [vmem:[%s1026_s2 + $0x258] sm:$0xff]  ;;  %v299_v18 = vld [vmem:[%s1026_s2 + $0x260] sm:$0xff]  ;;  %v292_v21 = vld [vmem:[%s1026_s2 + $0x228] sm:$0xff] }
  0x27   : > { %364 = vmatpush.msra.mxu1 %v237_v48  ;;  %404 = vmatpush.msra.mxu3 %v239_v51  ;;  %v290_v19 = vld [vmem:[%s1026_s2 + $0x218] sm:$0xff]  ;;  %v291_v20 = vld [vmem:[%s1026_s2 + $0x220] sm:$0xff]  ;;  %v284_v23 = vld [vmem:[%s1026_s2 + $0x1e8] sm:$0xff] }
  0x28   : > { %385 = vmatpush.msra.mxu2 %v231_v54  ;;  %420 = vmatpush.msrb.mxu0 %v268_v63  ;;  %v283_v22 = vld [vmem:[%s1026_s2 + $0x1e0] sm:$0xff]  ;;  %v285_v24 = vld [vmem:[%s1026_s2 + $0x1f0] sm:$0xff]  ;;  %v276_v25 = vld [vmem:[%s1026_s2 + $0x1a8] sm:$0xff] }
  0x29   : > { %365 = vmatpush.msra.mxu1 %v230_v52  ;;  %405 = vmatpush.msra.mxu3 %v232_v55  ;;  %v277_v26 = vld [vmem:[%s1026_s2 + $0x1b0] sm:$0xff]  ;;  %v278_v27 = vld [vmem:[%s1026_s2 + $0x1b8] sm:$0xff]  ;;  %v271_v30 = vld [vmem:[%s1026_s2 + $0x180] sm:$0xff] }
  0x2a   : > { %386 = vmatpush.msra.mxu2 %v224_v58  ;;  %421 = vmatpush.msrb.mxu0 %v261_v3  ;;  %v269_v28 = vld [vmem:[%s1026_s2 + $0x170] sm:$0xff]  ;;  %v270_v29 = vld [vmem:[%s1026_s2 + $0x178] sm:$0xff]  ;;  %v263_v33 = vld [vmem:[%s1026_s2 + $0x140] sm:$0xff] }
  0x2b   : > { %366 = vmatpush.msra.mxu1 %v223_v56  ;;  %406 = vmatpush.msra.mxu3 %v225_v59  ;;  %v233_v31 = vld [vmem:[%s1026_s2 + $0x50] sm:$0xff]  ;;  %v262_v32 = vld [vmem:[%s1026_s2 + $0x138] sm:$0xff]  ;;  %v264_v34 = vld [vmem:[%s1026_s2 + $0x148] sm:$0xff] }
  0x2c   : > { %451 = vmatpush.msrb.mxu2 %v333_v61  ;;  %422 = vmatpush.msrb.mxu0 %v254_v7  ;;  %v226_v35 = vld [vmem:[%s1026_s2 + $0x18] sm:$0xff]  ;;  %v255_v36 = vld [vmem:[%s1026_s2 + $0x100] sm:$0xff]  ;;  %v256_v37 = vld [vmem:[%s1026_s2 + $0x108] sm:$0xff] }
  0x2d   : > { %431 = vmatpush.msrb.mxu1 %v332_v60  ;;  %471 = vmatpush.msrb.mxu3 %v334_v62  ;;  %v257_v38 = vld [vmem:[%s1026_s2 + $0x110] sm:$0xff]  ;;  %v248_v39 = vld [vmem:[%s1026_s2 + $0xc8] sm:$0xff]  ;;  %v250_v41 = vld [vmem:[%s1026_s2 + $0xd8] sm:$0xff] }
  0x2e   : > { %452 = vmatpush.msrb.mxu2 %v326_v1  ;;  %423 = vmatpush.msrb.mxu0 %v247_v11  ;;  %v249_v40 = vld [vmem:[%s1026_s2 + $0xd0] sm:$0xff]  ;;  %v242_v43 = vld [vmem:[%s1026_s2 + $0x98] sm:$0xff]  ;;  %v243_v44 = vld [vmem:[%s1026_s2 + $0xa0] sm:$0xff] }
  0x2f   : > { %432 = vmatpush.msrb.mxu1 %v325_v0  ;;  %472 = vmatpush.msrb.mxu3 %v327_v2  ;;  %v241_v42 = vld [vmem:[%s1026_s2 + $0x90] sm:$0xff]  ;;  %v234_v45 = vld [vmem:[%s1026_s2 + $0x58] sm:$0xff]  ;;  %v235_v46 = vld [vmem:[%s1026_s2 + $0x60] sm:$0xff] }
  0x30   : > { %453 = vmatpush.msrb.mxu2 %v319_v5  ;;  %424 = vmatpush.msrb.mxu0 %v240_v15  ;;  %v236_v47 = vld [vmem:[%s1026_s2 + $0x68] sm:$0xff]  ;;  %v227_v48 = vld [vmem:[%s1026_s2 + $0x20] sm:$0xff]  ;;  %v229_v50 = vld [vmem:[%s1026_s2 + $0x30] sm:$0xff] }
  0x31   : > { %433 = vmatpush.msrb.mxu1 %v318_v4  ;;  %473 = vmatpush.msrb.mxu3 %v320_v6  ;;  %v228_v49 = vld [vmem:[%s1026_s2 + $0x28] sm:$0xff]  ;;  %v335_v53 = vld [vmem:[%s1027_s3] sm:$0x7f] }
  0x32   : > { %454 = vmatpush.msrb.mxu2 %v312_v9  ;;  %425 = vmatpush.msrb.mxu0 %v233_v31  ;;  %v337_v54 = vperm.slane %v335_v53, 0  ;;  %v340_v55 = vperm.slane %v335_v53, 3  ;;  %v338_v61 = vperm.slane %v335_v53, 1  ;;  %v339_v63 = vperm.slane %v335_v53, 2 }
  0x33   : > { %434 = vmatpush.msrb.mxu1 %v311_v8  ;;  %474 = vmatpush.msrb.mxu3 %v313_v10  ;;  %v341_v0 = vperm.slane %v335_v53, 4  ;;  %v342_v11 = vperm.slane %v335_v53, 5 }
  0x34   : > { %455 = vmatpush.msrb.mxu2 %v305_v13  ;;  %426 = vmatpush.msrb.mxu0 %v226_v35 }
  0x35   : > { %435 = vmatpush.msrb.mxu1 %v304_v12  ;;  %475 = vmatpush.msrb.mxu3 %v306_v14  ;;  %v343_v14 = vperm.slane %v335_v53, 6 }
  0x36   : > { %456 = vmatpush.msrb.mxu2 %v298_v17 }
  0x37   : > { %436 = vmatpush.msrb.mxu1 %v297_v16  ;;  %476 = vmatpush.msrb.mxu3 %v299_v18 }
  0x38   : > { %457 = vmatpush.msrb.mxu2 %v291_v20 }
  0x39   : > { %437 = vmatpush.msrb.mxu1 %v290_v19  ;;  %477 = vmatpush.msrb.mxu3 %v292_v21 }
  0x3a   : > { %458 = vmatpush.msrb.mxu2 %v284_v23 }
  0x3b   : > { %438 = vmatpush.msrb.mxu1 %v283_v22  ;;  %478 = vmatpush.msrb.mxu3 %v285_v24 }
  0x3c   : > { %459 = vmatpush.msrb.mxu2 %v277_v26 }
  0x3d   : > { %439 = vmatpush.msrb.mxu1 %v276_v25  ;;  %479 = vmatpush.msrb.mxu3 %v278_v27 }
  0x3e   : > { %460 = vmatpush.msrb.mxu2 %v270_v29 }
  0x3f   : > { %440 = vmatpush.msrb.mxu1 %v269_v28  ;;  %480 = vmatpush.msrb.mxu3 %v271_v30 }
  0x40   : > { %461 = vmatpush.msrb.mxu2 %v263_v33 }
  0x41   : > { %441 = vmatpush.msrb.mxu1 %v262_v32  ;;  %481 = vmatpush.msrb.mxu3 %v264_v34 }
  0x42   : > { %462 = vmatpush.msrb.mxu2 %v256_v37 }
  0x43   : > { %442 = vmatpush.msrb.mxu1 %v255_v36  ;;  %482 = vmatpush.msrb.mxu3 %v257_v38 }
  0x44   : > { %463 = vmatpush.msrb.mxu2 %v249_v40 }
  0x45   : > { %443 = vmatpush.msrb.mxu1 %v248_v39  ;;  %483 = vmatpush.msrb.mxu3 %v250_v41 }
  0x46   : > { %464 = vmatpush.msrb.mxu2 %v242_v43 }
  0x47   : > { %444 = vmatpush.msrb.mxu1 %v241_v42  ;;  %484 = vmatpush.msrb.mxu3 %v243_v44 }
  0x48   : > { %465 = vmatpush.msrb.mxu2 %v235_v46 }
  0x49   : > { %445 = vmatpush.msrb.mxu1 %v234_v45  ;;  %485 = vmatpush.msrb.mxu3 %v236_v47 }
  0x4a   : > { %466 = vmatpush.msrb.mxu2 %v228_v49 }
  0x4b   : > { %446 = vmatpush.msrb.mxu1 %v227_v48  ;;  %486 = vmatpush.msrb.mxu3 %v229_v50 }
  0x8f   : > { %v219_v51 = vpop.f32.mrf.mxu0 }
  0x90   : > { %v222_v52 = vmax.f32 %v219_v51, 0.0 }
  0x92   : > { %367 = vmatmul.f32.vlgmr.msra.gmra.mxu1 %v222_v52  ;;  %387 = vmatmul.f32.vlgmr.msra.gmra.mxu2 %v222_v52 }
  0x93   : > { %407 = vmatmul.f32.vlgmr.msra.gmra.mxu3 %v222_v52  ;;  %427 = vmatmul.f32.vlgmr.msrb.gmra.mxu0 %v222_v52 }
  0x9a   : > { %447 = vmatmul.f32.vlgmr.msrb.gmra.mxu1 %v222_v52  ;;  %467 = vmatmul.f32.vlgmr.msrb.gmra.mxu2 %v222_v52 }
  0x9b   : > { %487 = vmatmul.f32.vlgmr.msrb.gmra.mxu3 %v222_v52 }
 0x10f   : > { %v368_v56 = vpop.f32.mrf.mxu1 }
 0x110   : > { %v369_v57 = vadd.f32 %v368_v56, %v337_v54  ;;  %v428_v58 = vpop.f32.mrf.mxu0 }
 0x111   : > { %v429_v59 = vadd.f32 %v428_v58, %v340_v55 }
 0x112   : > { %v491_v60 = vmul.f32 0.5, %v369_v57 }
 0x113   : > { %v494_v62 = vmul.f32 0.5, %v429_v59 }
 0x114   : > { %600 = vtanh.f32 %v491_v60 }
 0x115   : > { %602 = vtanh.f32 %v494_v62  ;;  %v388_v1 = vpop.f32.mrf.mxu2 }
 0x116   : > { %v389_v2 = vadd.f32 %v388_v1, %v338_v61  ;;  %v408_v3 = vpop.f32.mrf.mxu3 }
 0x117   : > { %v409_v4 = vadd.f32 %v408_v3, %v339_v63  ;;  %v448_v5 = vpop.f32.mrf.mxu1 }
 0x118   : > { %v492_v6 = vmul.f32 0.5, %v389_v2  ;;  %v449_v7 = vadd.f32 %v448_v5, %v341_v0 }
 0x119   : > { %v493_v8 = vmul.f32 0.5, %v409_v4 }
 0x11a   : > { %v601_v9 = vpop.eup %600  ;;  %604 = vtanh.f32 %v492_v6  ;;  %v495_v10 = vmul.f32 0.5, %v449_v7 }
 0x11b   : > { %v603_v12 = vpop.eup %602  ;;  %v505_v13 = vadd.f32 1.0, %v601_v9  ;;  %606 = vtanh.f32 %v493_v8 }
 0x11c   : > { %v508_v15 = vadd.f32 1.0, %v603_v12  ;;  %608 = vtanh.f32 %v495_v10 }
 0x11d   : > { %v512_v16 = vmul.f32 0.5, %v505_v13  ;;  %v468_v17 = vpop.f32.mrf.mxu2 }
 0x11e   : > { %v515_v18 = vmul.f32 0.5, %v508_v15  ;;  %v469_v19 = vadd.f32 %v468_v17, %v342_v11  ;;  %v488_v20 = vpop.f32.mrf.mxu3 }
 0x11f   : > { %519 = vst [vmem:[%s1011_s12] sm:$0xff] %v512_v16  ;;  %v489_v21 = vadd.f32 %v488_v20, %v343_v14 }
 0x120   : > { %v605_v22 = vpop.eup %604  ;;  %522 = vst [vmem:[%s1011_s12 + $0x18] sm:$0xff] %v515_v18  ;;  %v496_v23 = vmul.f32 0.5, %v469_v19 }
 0x121   : > { %v607_v24 = vpop.eup %606  ;;  %v506_v25 = vadd.f32 1.0, %v605_v22  ;;  %v497_v26 = vmul.f32 0.5, %v489_v21 }
 0x122   : > { %v609_v27 = vpop.eup %608  ;;  %v507_v28 = vadd.f32 1.0, %v607_v24  ;;  %610 = vtanh.f32 %v496_v23 }
 0x123   : > { %v513_v29 = vmul.f32 0.5, %v506_v25  ;;  %v509_v30 = vadd.f32 1.0, %v609_v27  ;;  %612 = vtanh.f32 %v497_v26 }
 0x124   : > { %v514_v31 = vmul.f32 0.5, %v507_v28 }
 0x125   : > { %520 = vst [vmem:[%s1011_s12 + $0x8] sm:$0xff] %v513_v29  ;;  %v516_v32 = vmul.f32 0.5, %v509_v30 }
 0x126   : > { %521 = vst [vmem:[%s1011_s12 + $0x10] sm:$0xff] %v514_v31 }
 0x127   : > { %523 = vst [vmem:[%s1011_s12 + $0x20] sm:$0xff] %v516_v32 }
 0x128   : > { %v611_v33 = vpop.eup %610 }
 0x129   : > { %v613_v34 = vpop.eup %612  ;;  %v510_v35 = vadd.f32 1.0, %v611_v33 }
 0x12a   : > { %v511_v36 = vadd.f32 1.0, %v613_v34 }
 0x12b   : > { %v517_v37 = vmul.f32 0.5, %v510_v35 }
 0x12c   : > { %v518_v38 = vmul.f32 0.5, %v511_v36 }
 0x12d   : > { %524 = vst [vmem:[%s1011_s12 + $0x28] sm:$0xff] %v517_v37 }
 0x12e   : > { %525 = vst.msk [vmem:[%s1011_s12 + $0x30] sm:$0xff] %vm198_vm0, %v518_v38 }
 0x12f PF: > { %s14_s15 = sadd.s32 1, %s620_s15  }
 0x130   : > { %p11_p4 = scmp.ge.s32.totalorder %s14_s15, 4  }
 0x132   :  { %13 = sbr.rel (!%p11_p4) target bundleno = 1 (0x1), region = 66 }

</bundles_post_ra>
